<compile_context>
chip_gen: v5e
topology: v5e:2x2
jax: 0.10.0
libtpu: 0.0.40
codegen_flags: <defaults>
</compile_context>

<pallas_src>
import jax
import jax.numpy as jnp
from jax.experimental import pallas as pl
from jax.experimental.pallas import tpu as pltpu


def _round_up(x, m):
    return ((x + m - 1) // m) * m


def mlp_kernel(x_ref, w1_ref, b1_ref, w2_ref, b2_ref, w3_ref, b3_ref, o_ref):
    """One row-tile of the fused MLP. Weights/biases are VMEM-resident."""
    # Hoist bias loads once per invocation (do not re-read inside any future loop).
    b1 = b1_ref[...]
    b2 = b2_ref[...]
    b3 = b3_ref[...]

    matmul_dtype = w1_ref.dtype
    x = x_ref[...]

    # fc1 + ReLU   (bf16 MXU operands, f32 accumulation + f32 epilogue)
    h = jnp.dot(x, w1_ref[...], preferred_element_type=jnp.float32) + b1
    h = jnp.maximum(h, 0.0)
    # dropout (eval mode) -> identity

    # fc2 + ReLU
    h = jnp.dot(h.astype(matmul_dtype), w2_ref[...],
                preferred_element_type=jnp.float32) + b2
    h = jnp.maximum(h, 0.0)
    # dropout (eval mode) -> identity

    # fc3 (no activation); output width is already lane-padded to 128 multiple.
    out = jnp.dot(h.astype(matmul_dtype), w3_ref[...],
                  preferred_element_type=jnp.float32) + b3
    o_ref[...] = out.astype(o_ref.dtype)


def simple_mlp_forward(x, w1, b1, w2, b2, w3, b3,
                       *, block_batch=128, matmul_dtype=jnp.bfloat16):
    """x: [batch, input_dim]; weights stored [in, out]; biases [1, out]. Returns f32 [batch, output_dim]."""
    batch, input_dim = x.shape
    hidden_dim = w1.shape[1]
    output_dim = w3.shape[1]

    # --- Lane-dense output padding (16 -> 128) -------------------------------
    out_pad = _round_up(output_dim, 128)
    if out_pad != output_dim:
        w3 = jnp.pad(w3, ((0, 0), (0, out_pad - output_dim)))
        b3 = jnp.pad(b3, ((0, 0), (0, out_pad - output_dim)))

    # --- Batch row tiling ----------------------------------------------------
    bb = min(block_batch, _round_up(batch, 8))      # sublane-aligned row tile
    padded_batch = _round_up(batch, bb)
    if padded_batch != batch:
        x = jnp.pad(x, ((0, padded_batch - batch), (0, 0)))
    grid = (padded_batch // bb,)

    # --- dtype policy: bf16 matmul operands, f32 biases/accumulation ---------
    x_m = x.astype(matmul_dtype)
    w1_m = w1.astype(matmul_dtype)
    w2_m = w2.astype(matmul_dtype)
    w3_m = w3.astype(matmul_dtype)
    b1_f = b1.astype(jnp.float32)
    b2_f = b2.astype(jnp.float32)
    b3_f = b3.astype(jnp.float32)

    resident = lambda shape: pl.BlockSpec(shape, lambda i: (0, 0))

    out_padded = pl.pallas_call(
        mlp_kernel,
        out_shape=jax.ShapeDtypeStruct((padded_batch, out_pad), jnp.float32),
        grid=grid,
        in_specs=[
            pl.BlockSpec((bb, input_dim), lambda i: (i, 0)),   # x: tiled on rows
            resident((input_dim, hidden_dim)),                 # w1
            resident((1, hidden_dim)),                         # b1
            resident((hidden_dim, hidden_dim)),                # w2
            resident((1, hidden_dim)),                         # b2
            resident((hidden_dim, out_pad)),                   # w3 (padded)
            resident((1, out_pad)),                            # b3 (padded)
        ],
        out_specs=pl.BlockSpec((bb, out_pad), lambda i: (i, 0)),
        compiler_params=pltpu.CompilerParams(
            dimension_semantics=("parallel",),   # shard row tiles across TCs (v7x)
        ),
    )(x_m, w1_m, b1_f, w2_m, b2_f, w3_m, b3_f)

    return out_padded[:batch, :output_dim]


def init_linear_params(key, in_features, out_features):
    """Deterministic init mimicking nn.Linear (uniform +-1/sqrt(fan_in)); stored [in, out]."""
    kw, kb = jax.random.split(key)
    bound = 1.0 / jnp.sqrt(jnp.float32(in_features))
    w = jax.random.uniform(kw, (in_features, out_features), jnp.float32, -bound, bound)
    b = jax.random.uniform(kb, (1, out_features), jnp.float32, -bound, bound)
    return w, b


def reference_forward(x, w1, b1, w2, b2, w3, b3, matmul_dtype=jnp.bfloat16):
    """Pure-JAX reference with the same bf16-operand / f32-accumulate policy."""
    h = jnp.dot(x.astype(matmul_dtype), w1.astype(matmul_dtype),
                preferred_element_type=jnp.float32) + b1
    h = jnp.maximum(h, 0.0)
    h = jnp.dot(h.astype(matmul_dtype), w2.astype(matmul_dtype),
                preferred_element_type=jnp.float32) + b2
    h = jnp.maximum(h, 0.0)
    return jnp.dot(h.astype(matmul_dtype), w3.astype(matmul_dtype),
                   preferred_element_type=jnp.float32) + b3


if __name__ == "__main__":
    # Small but tiling-exercising shapes consistent with the module's forward.
    batch, input_dim, hidden_dim, output_dim = 256, 256, 128, 16

    key = jax.random.PRNGKey(0)
    kx, k1, k2, k3 = jax.random.split(key, 4)

    x = jax.random.normal(kx, (batch, input_dim), jnp.float32)
    w1, b1 = init_linear_params(k1, input_dim, hidden_dim)
    w2, b2 = init_linear_params(k2, hidden_dim, hidden_dim)
    w3, b3 = init_linear_params(k3, hidden_dim, output_dim)

    out = simple_mlp_forward(x, w1, b1, w2, b2, w3, b3, block_batch=128)
    out = jax.block_until_ready(out)

    ref = reference_forward(x, w1, b1, w2, b2, w3, b3)
    assert out.shape == (batch, output_dim), out.shape
    assert jnp.allclose(out, ref, atol=5e-3, rtol=5e-3), float(jnp.max(jnp.abs(out - ref)))

    print("KERNEL_OK")
</pallas_src>

<mosaic_0001>
module attributes {stable_mosaic.version = 11 : i64} {
  func.func @mlp_kernel(%arg0: i32, %arg1: memref<128x256xbf16, #tpu.memory_space<vmem>>, %arg2: memref<256x128xbf16, #tpu.memory_space<vmem>>, %arg3: memref<1x128xf32, #tpu.memory_space<vmem>>, %arg4: memref<128x128xbf16, #tpu.memory_space<vmem>>, %arg5: memref<1x128xf32, #tpu.memory_space<vmem>>, %arg6: memref<128x128xbf16, #tpu.memory_space<vmem>>, %arg7: memref<1x128xf32, #tpu.memory_space<vmem>>, %arg8: memref<128x128xf32, #tpu.memory_space<vmem>>) attributes {dimension_semantics = [#tpu.dimension_semantics<parallel>], iteration_bounds = array<i64: 2>, scalar_prefetch = 0 : i64, scratch_operands = 0 : i64, tpu.core_type = #tpu.core_type<tc>, window_params = [{transform_indices = @transform_0, window_bounds = array<i64: 128, 256>}, {pipeline_mode = #tpu.pipeline_mode<synchronous>, transform_indices = @transform_1, window_bounds = array<i64: 256, 128>}, {pipeline_mode = #tpu.pipeline_mode<synchronous>, transform_indices = @transform_2, window_bounds = array<i64: 1, 128>}, {pipeline_mode = #tpu.pipeline_mode<synchronous>, transform_indices = @transform_3, window_bounds = array<i64: 128, 128>}, {pipeline_mode = #tpu.pipeline_mode<synchronous>, transform_indices = @transform_4, window_bounds = array<i64: 1, 128>}, {pipeline_mode = #tpu.pipeline_mode<synchronous>, transform_indices = @transform_5, window_bounds = array<i64: 128, 128>}, {pipeline_mode = #tpu.pipeline_mode<synchronous>, transform_indices = @transform_6, window_bounds = array<i64: 1, 128>}, {transform_indices = @transform_7, window_bounds = array<i64: 128, 128>}]} {
    %c0 = arith.constant 0 : index
    %c0_0 = arith.constant 0 : index
    %0 = vector.load %arg3[%c0, %c0_0] : memref<1x128xf32, #tpu.memory_space<vmem>>, vector<1x128xf32>
    %c0_1 = arith.constant 0 : index
    %c0_2 = arith.constant 0 : index
    %1 = vector.load %arg5[%c0_1, %c0_2] : memref<1x128xf32, #tpu.memory_space<vmem>>, vector<1x128xf32>
    %c0_3 = arith.constant 0 : index
    %c0_4 = arith.constant 0 : index
    %2 = vector.load %arg7[%c0_3, %c0_4] : memref<1x128xf32, #tpu.memory_space<vmem>>, vector<1x128xf32>
    %c0_5 = arith.constant 0 : index
    %c0_6 = arith.constant 0 : index
    %3 = vector.load %arg1[%c0_5, %c0_6] : memref<128x256xbf16, #tpu.memory_space<vmem>>, vector<128x256xbf16>
    %c0_7 = arith.constant 0 : index
    %c0_8 = arith.constant 0 : index
    %4 = vector.load %arg2[%c0_7, %c0_8] : memref<256x128xbf16, #tpu.memory_space<vmem>>, vector<256x128xbf16>
    %cst = arith.constant dense<0.000000e+00> : vector<128x128xf32>
    %5 = tpu.matmul %3, %4, %cst {dimension_numbers = #tpu.dot_dimension_numbers<[1], [0], [0], [1], [0, 0, 1, 1], [], []>} : vector<128x256xbf16>, vector<256x128xbf16>, vector<128x128xf32> -> vector<128x128xf32>
    %6 = vector.broadcast %0 : vector<1x128xf32> to vector<128x128xf32>
    %7 = arith.addf %5, %6 : vector<128x128xf32>
    %cst_9 = arith.constant 0.000000e+00 : f32
    %8 = vector.broadcast %cst_9 : f32 to vector<128x128xf32>
    %9 = arith.maximumf %7, %8 : vector<128x128xf32>
    %10 = arith.truncf %9 : vector<128x128xf32> to vector<128x128xbf16>
    %c0_10 = arith.constant 0 : index
    %c0_11 = arith.constant 0 : index
    %11 = vector.load %arg4[%c0_10, %c0_11] : memref<128x128xbf16, #tpu.memory_space<vmem>>, vector<128x128xbf16>
    %cst_12 = arith.constant dense<0.000000e+00> : vector<128x128xf32>
    %12 = tpu.matmul %10, %11, %cst_12 {dimension_numbers = #tpu.dot_dimension_numbers<[1], [0], [0], [1], [0, 0, 1, 1], [], []>} : vector<128x128xbf16>, vector<128x128xbf16>, vector<128x128xf32> -> vector<128x128xf32>
    %13 = vector.broadcast %1 : vector<1x128xf32> to vector<128x128xf32>
    %14 = arith.addf %12, %13 : vector<128x128xf32>
    %cst_13 = arith.constant 0.000000e+00 : f32
    %15 = vector.broadcast %cst_13 : f32 to vector<128x128xf32>
    %16 = arith.maximumf %14, %15 : vector<128x128xf32>
    %17 = arith.truncf %16 : vector<128x128xf32> to vector<128x128xbf16>
    %c0_14 = arith.constant 0 : index
    %c0_15 = arith.constant 0 : index
    %18 = vector.load %arg6[%c0_14, %c0_15] : memref<128x128xbf16, #tpu.memory_space<vmem>>, vector<128x128xbf16>
    %cst_16 = arith.constant dense<0.000000e+00> : vector<128x128xf32>
    %19 = tpu.matmul %17, %18, %cst_16 {dimension_numbers = #tpu.dot_dimension_numbers<[1], [0], [0], [1], [0, 0, 1, 1], [], []>} : vector<128x128xbf16>, vector<128x128xbf16>, vector<128x128xf32> -> vector<128x128xf32>
    %20 = vector.broadcast %2 : vector<1x128xf32> to vector<128x128xf32>
    %21 = arith.addf %19, %20 : vector<128x128xf32>
    %c0_17 = arith.constant 0 : index
    %c0_18 = arith.constant 0 : index
    %22 = vector.load %arg8[%c0_17, %c0_18] : memref<128x128xf32, #tpu.memory_space<vmem>>, vector<128x128xf32>
    tpu.vector_store %arg8[%c0_17, %c0_18], %21 {strides = array<i32>} : memref<128x128xf32, #tpu.memory_space<vmem>>, vector<128x128xf32>,
    return
  }
  func.func @transform_0(%arg0: i32) -> (i32, i32) {
    %c0_i32 = arith.constant 0 : i32
    %c0_i32_0 = arith.constant 0 : i32
    return %arg0, %c0_i32 : i32, i32
  }
  func.func @transform_1(%arg0: i32) -> (i32, i32) {
    %c0_i32 = arith.constant 0 : i32
    %c0_i32_0 = arith.constant 0 : i32
    %c0_i32_1 = arith.constant 0 : i32
    return %c0_i32, %c0_i32_0 : i32, i32
  }
  func.func @transform_2(%arg0: i32) -> (i32, i32) {
    %c0_i32 = arith.constant 0 : i32
    %c0_i32_0 = arith.constant 0 : i32
    %c0_i32_1 = arith.constant 0 : i32
    return %c0_i32, %c0_i32_0 : i32, i32
  }
  func.func @transform_3(%arg0: i32) -> (i32, i32) {
    %c0_i32 = arith.constant 0 : i32
    %c0_i32_0 = arith.constant 0 : i32
    %c0_i32_1 = arith.constant 0 : i32
    return %c0_i32, %c0_i32_0 : i32, i32
  }
  func.func @transform_4(%arg0: i32) -> (i32, i32) {
    %c0_i32 = arith.constant 0 : i32
    %c0_i32_0 = arith.constant 0 : i32
    %c0_i32_1 = arith.constant 0 : i32
    return %c0_i32, %c0_i32_0 : i32, i32
  }
  func.func @transform_5(%arg0: i32) -> (i32, i32) {
    %c0_i32 = arith.constant 0 : i32
    %c0_i32_0 = arith.constant 0 : i32
    %c0_i32_1 = arith.constant 0 : i32
    return %c0_i32, %c0_i32_0 : i32, i32
  }
  func.func @transform_6(%arg0: i32) -> (i32, i32) {
    %c0_i32 = arith.constant 0 : i32
    %c0_i32_0 = arith.constant 0 : i32
    %c0_i32_1 = arith.constant 0 : i32
    return %c0_i32, %c0_i32_0 : i32, i32
  }
  func.func @transform_7(%arg0: i32) -> (i32, i32) {
    %c0_i32 = arith.constant 0 : i32
    %c0_i32_0 = arith.constant 0 : i32
    return %arg0, %c0_i32 : i32, i32
  }
}

</mosaic_0001>

<bundles_post_ra>
// kernel: tpu_custom_call.1
= control target key start
LH: loop header
LB: loop body
LE: loop exit
PB: predicated region body
PF: predicated region fallthrough
CT: control target
= control target key end

     0   :  { %s1933_s0 = inlined_call_operand.hbm [shape: bf16[256,256], index: 0, kind: input, shape index: {}]   ;;  %s1934_s1 = inlined_call_operand.hbm [shape: bf16[256,128], index: 1, kind: input, shape index: {}]   ;;  %s1935_s2 = inlined_call_operand.vmem [shape: f32[1,128], index: 2, kind: input, shape index: {}]   ;;  %s1936_s3 = inlined_call_operand.hbm [shape: bf16[128,128], index: 3, kind: input, shape index: {}]   ;;  %s1937_s4 = inlined_call_operand.vmem [shape: f32[1,128], index: 4, kind: input, shape index: {}]   ;;  %s1938_s5 = inlined_call_operand.hbm [shape: bf16[128,128], index: 5, kind: input, shape index: {}]   ;;  %s1939_s6 = inlined_call_operand.vmem [shape: f32[1,128], index: 6, kind: input, shape index: {}]   ;;  %s1940_s7 = inlined_call_operand.hbm [shape: f32[256,128], index: 7, kind: output, shape index: {}]  }
   0x1   :  { %1941 = sst [smem:[#allocation15_spill]] %s1934_s1 }
   0x2   :  { %12 = vsyncpa [#allocation3], 0 }
   0x3   :  { %14 = vsyncpa [#allocation3 + $0x1], 0 }
   0x4   :  { %15 = vsyncpa [#allocation6], 0 }
   0x5   :  { %16 = vsyncpa [#allocation9], 0 }
   0x6   :  { %17 = vsyncpa [#allocation4], 0 }
   0x7   :  { %19 = vsyncpa [#allocation4 + $0x1], 0  ;;  %s1689_s24 = smov 0   ;;  %s1691_s25 = smov 0  }
   0x8   :  { %s1693_s26 = smov 0   ;;  %s1695_s27 = smov 0  }
   0x9 LB: > { %s1710_s28 = sadd.s32 4294967295, %s1638_s27   ;;  %s1094_s29 = sadd.s32 4294967294, %s1638_s27   ;;  %s1638_s27 = sphi %s1695_s27, %s1953_s27   ;;  %s1634_s26 = sphi %s1693_s26, %s1952_s26   ;;  %s1630_s25 = sphi %s1691_s25, %s1951_s25   ;;  %s1626_s24 = sphi %s1689_s24, %s1950_s24  }
   0xa   : > { %p45_p0 = scmp.ne.s32.totalorder %s1630_s25, %s1626_s24  ;;  %p46_p1 = scmp.eq.s32.totalorder %s1710_s28, 0 }
   0xb   : > { %p195_p2 = scmp.eq.s32.totalorder %s1710_s28, 1  ;;  %p201_p3 = scmp.eq.s32.totalorder %s1094_s29, 1 }
   0xc   : > { %p1719_p4 = por %p46_p1, %p45_p0  ;;  %p1095_p5 = scmp.ge.s32.totalorder %s1638_s27, 1 }
   0xd   : > { %p1724_p6 = por %p201_p3, %p45_p0  ;;  %p208_p7 = scmp.lt.s32.totalorder %s1638_s27, 3 }
   0xe   : > { %s1944_s1 = sld [smem:[#allocation15_spill]]  ;;  %s1640_s13 = smov [#allocation5]  }
   0xf   : > { %p1732_p8 = pnand %p1095_p5, %p208_p7  ;;  %s221_s14 = sshll.u32 %s1640_s13, 4  ;;  %s222_s14 = int_to_ptr.vmem [resolvable:$true] %s221_s14 }
  0x10   : > { %s236_s18 = sshll.u32 %s1936_s3, 4  ;;  %s1641_s19 = smov 64   ;;  %s237_s18 = int_to_ptr.hbm [resolvable:$true] %s236_s18 }
  0x11   : > { %p1374_p9 = pneg %p1732_p8  ;;  %s1642_s20 = smov 4  }
  0x12   : > { %s1643_s21 = smov [#allocation7]   ;;  %s253_s9 = sshll.u32 %s1938_s5, 4  ;;  %s254_s9 = int_to_ptr.hbm [resolvable:$true] %s253_s9 }
  0x13   : > { %p1740_p10 = pnand %p1374_p9, %p46_p1  ;;  %s238_s22 = sshll.u32 %s1643_s21, 4  ;;  %s239_s22 = int_to_ptr.vmem [resolvable:$true] %s238_s22 }
  0x14   : > { %s219_s11 = sshll.u32 %s1944_s1, 4  ;;  %s1644_s10 = smov [#allocation8]   ;;  %s220_s11 = int_to_ptr.hbm [resolvable:$true] %s219_s11 }
  0x15   : > { %1377 = dma.hbm_to_vmem [thread:$0]  (!%p1740_p10), %s220_s11, 2048, %s222_s14, [#allocation6], %s1641_s19, %s1641_s19, %s1642_s20  }
  0x16   : > { %1380 = dma.hbm_to_vmem [thread:$0]  (!%p1740_p10), %s237_s18, 1024, %s239_s22, [#allocation6], %s1641_s19, %s1641_s19, %s1642_s20  }
  0x17   : > { %s255_s13 = sshll.u32 %s1644_s10, 4  ;;  %s1756_s11 = sadd.s32 1, %s1638_s27   ;;  %s256_s13 = int_to_ptr.vmem [resolvable:$true] %s255_s13 }
  0x18   : > { %1383 = dma.hbm_to_vmem [thread:$0]  (!%p1740_p10), %s254_s9, 1024, %s256_s13, [#allocation9], %s1641_s19, %s1641_s19, %s1642_s20  }
  0x19   : > { %s29_s14 = ssub.s32 %s1638_s27, %s1756_s11  ;;  %s32_s16 = sadd.s32 1, %s1634_s26 }
  0x1a   : > { %p30_p12 = scmp.eq.s32.totalorder %s29_s14, 0  ;;  %p39_p13 = scmp.ne.s32.totalorder %s1634_s26, %s1630_s25 }
  0x1b   : > { %p40_p0 = scmp.eq.s32.totalorder %s1638_s27, 0  ;;  %p1395_p3 = scmp.lt.s32.totalorder %s1638_s27, 2 }
  0x1c   : > { %s1768_s17 = scalar_select %p30_p12, %s1634_s26, %s32_s16  }
  0x1d   : > { %p41_p5 = por %p40_p0, %p39_p13  ;;  %p1772_p7 = por %p195_p2, %p39_p13 }
  0x1e   : > { %s272_s21 = sand.u32 1, %s1634_s26   ;;  %s1308_s22 = sshll.u32 %s1638_s27, 7 }
  0x1f   : > { %s1100_s15 = sshll.u32 %s272_s21, 7  ;;  %s282_s20 = scalar_lea.hbm %s1933_s0, %s1308_s22 }
  0x20   : > { %s283_s29 = sshll.u32 %s282_s20, 4  ;;  %s276_s9 = scalar_lea.vmem [#allocation2], %s1100_s15  ;;  %s284_s29 = int_to_ptr.hbm [resolvable:$true] %s283_s29 }
  0x21   : > { %s285_s10 = sshll.u32 %s276_s9, 4  ;;  %p1783_p9 = pnand %p1395_p3, %p41_p5  ;;  %s286_s10 = int_to_ptr.vmem [resolvable:$true] %s285_s10 }
  0x22   : > { %s273_s14 = scalar_lea.sflag [#allocation3], %s272_s21  ;;  %s1534_s16 = sshra.s32 %s284_s29, 4  ;;  %s1535_s16 = int_to_ptr.hbm [resolvable:$true] %s1534_s16 }
  0x23   : > { %s1536_s1 = scalar_lea.hbm %s1535_s16, 128  ;;  %p1538_p10 = pneg %p1783_p9 }
  0x24   : > { %p1537_p2 = scmp.ne.s32.totalorder %s1535_s16, %s1536_s1  ;;  %s1541_s23 = scalar_lea.hbm %s1933_s0, 256 }
  0x25   : > { %p1542_p0 = scmp.lt.s32.totalorder %s1535_s16, %s1933_s0  ;;  %p1543_p3 = scmp.lt.s32.totalorder %s1541_s23, %s1536_s1 }
  0x26   : > { %p1539_p12 = pnand %p1538_p10, %p1537_p2 }
  0x27   : > { %p1544_p5 = por %p1543_p3, %p1542_p0 }
  0x28   : > { %p1540_p13 = pneg %p1539_p12 }
  0x2a   : > { %p1545_p11 = pnand %p1544_p5, %p1540_p13 }
  0x2c   : > { %1548 = shalt.err (!%p1545_p11)
}
  0x2d   : > { %s1645_s21 = smov 128   ;;  %s1646_s9 = smov 8  }
  0x2e   : > { %1387 = dma.hbm_to_vmem [thread:$0]  (!%p1783_p9), %s284_s29, 2048, %s286_s10, %s273_s14, %s1645_s21, %s1645_s21, %s1646_s9  }
  0x2f   : > { %297 = sbr.rel (%p1732_p8) target bundleno = 635 (0x27b), region = 48  ;;  %s1800_s22 = sand.u32 (!%p1732_p8), 1, %s1630_s25  }
  0x30   : > { %s1105_s16 = sshll.u32 (!%p1732_p8), %s1800_s22, 7  ;;  %s300_s1 = scalar_lea.sflag (!%p1732_p8), [#allocation3], %s1800_s22 }
  0x31   : > { %s1806_s15 = scalar_lea.vmem (!%p1732_p8), [#allocation2], %s1105_s16 }
  0x34   : > { %1609 = dma.done.wait (%p1719_p4), %s300_s1, 2048  }
  0x35   : > { %1611 = vsyncadd (%p1719_p4), %s300_s1, 4294965248 }
  0x36   : > { %1613 = dma.done.wait (%p46_p1), [#allocation6], 3072  }
  0x37   : > { %1615 = vsyncadd (%p46_p1), [#allocation6], 4294964224 }
  0x38   : > { %1617 = dma.done.wait (%p46_p1), [#allocation9], 1024  }
  0x39   : > { %1619 = vsyncadd (%p46_p1), [#allocation9], 4294966272  ;;  %v1332_v0 = vld [vmem:[#allocation5 + $0x38] sm:$0xff]  ;;  %v1331_v2 = vld [vmem:[#allocation5 + $0x30] sm:$0xff]  ;;  %s1881_s23 = scalar_lea.vmem [#allocation10], %s1105_s16  ;;  %s1357_s19 = sshll.u32 %s1710_s28, 7 }
  0x3a   : > { %v1340_v1 = vld [vmem:[#allocation5 + $0x78] sm:$0xff]  ;;  %582 = vmatpush.bf16.msra.mxu0 %v1332_v0  ;;  %v1339_v3 = vld [vmem:[#allocation5 + $0x70] sm:$0xff]  ;;  %v1330_v4 = vld [vmem:[#allocation5 + $0x28] sm:$0xff]  ;;  %s988_s9 = scalar_lea.hbm %s1940_s7, %s1357_s19  ;;  %s989_s16 = sshll.u32 %s1881_s23, 4  ;;  %s990_s16 = int_to_ptr.vmem [resolvable:$true] %s989_s16 }
  0x3b   : > { %631 = vmatpush.bf16.msra.mxu1 %v1340_v1  ;;  %v1338_v5 = vld [vmem:[#allocation5 + $0x68] sm:$0xff]  ;;  %v1329_v6 = vld [vmem:[#allocation5 + $0x20] sm:$0xff]  ;;  %v1328_v8 = vld [vmem:[#allocation5 + $0x18] sm:$0xff]  ;;  %s991_s1 = sshll.u32 %s988_s9, 4  ;;  %s1584_s10 = scalar_lea.hbm %s1940_s7, 256  ;;  %s992_s1 = int_to_ptr.hbm [resolvable:$true] %s991_s1 }
  0x3c   : > { %v1337_v7 = vld [vmem:[#allocation5 + $0x60] sm:$0xff]  ;;  %v1336_v9 = vld [vmem:[#allocation5 + $0x58] sm:$0xff]  ;;  %v1327_v10 = vld [vmem:[#allocation5 + $0x10] sm:$0xff]  ;;  %s1578_s30 = sshra.s32 %s992_s1, 4  ;;  %s1579_s30 = int_to_ptr.hbm [resolvable:$true] %s1578_s30 }
  0x3d   : > { %v1335_v11 = vld [vmem:[#allocation5 + $0x50] sm:$0xff]  ;;  %v1326_v12 = vld [vmem:[#allocation5 + $0x8] sm:$0xff]  ;;  %v1325_v14 = vld [vmem:[#allocation5] sm:$0xff]  ;;  %s1580_s12 = scalar_lea.hbm %s1579_s30, 128  ;;  %p1585_p11 = scmp.lt.s32.totalorder %s1579_s30, %s1940_s7 }
  0x3e   : > { %583 = vmatpush.bf16.msra.mxu0 %v1331_v2  ;;  %v1334_v13 = vld [vmem:[#allocation5 + $0x48] sm:$0xff]  ;;  %v1333_v15 = vld [vmem:[#allocation5 + $0x40] sm:$0xff]  ;;  %v1120_v22 = vld [vmem:[%s1806_s15 + $0x10] sm:$0xf]  ;;  %p1581_p1 = scmp.ne.s32.totalorder %s1579_s30, %s1580_s12  ;;  %p1586_p9 = scmp.lt.s32.totalorder %s1584_s10, %s1580_s12 }
  0x3f   : > { %632 = vmatpush.bf16.msra.mxu1 %v1339_v3  ;;  %v1112_v16 = vld [vmem:[%s1806_s15] sm:$0xf]  ;;  %v1310_v17 = vld [vmem:[%s1806_s15 + $0x4] sm:$0xf0]  ;;  %v1309_v18 = vld [vmem:[%s1806_s15 + $0x4] sm:$0xf] }
  0x40   : > { %v1114_v19 = vld [vmem:[%s1806_s15 + $0x8] sm:$0xf0]  ;;  %v1113_v20 = vor.u32 %v1310_v17, %v1112_v16  ;;  %v1312_v23 = vld [vmem:[%s1806_s15 + $0x14] sm:$0xf0]  ;;  %v1311_v24 = vld [vmem:[%s1806_s15 + $0x14] sm:$0xf]  ;;  %p1582_p4 = pnand %p1581_p1, %p1772_p7  ;;  %p1587_p2 = por %p1586_p9, %p1585_p11 }
  0x41   : > { %v1117_v21 = vor.u32 %v1309_v18, %v1114_v19  ;;  %v1122_v25 = vld [vmem:[%s1806_s15 + $0x18] sm:$0xf0]  ;;  %v1121_v26 = vor.u32 %v1312_v23, %v1120_v22  ;;  %v1128_v28 = vld [vmem:[%s1806_s15 + $0x20] sm:$0xf]  ;;  %v1314_v29 = vld [vmem:[%s1806_s15 + $0x24] sm:$0xf0] }
  0x42   : > { %584 = vmatpush.bf16.msra.mxu0 %v1330_v4  ;;  %v1125_v27 = vor.u32 %v1311_v24, %v1122_v25  ;;  %v1313_v30 = vld [vmem:[%s1806_s15 + $0x24] sm:$0xf]  ;;  %v1130_v31 = vld [vmem:[%s1806_s15 + $0x28] sm:$0xf0]  ;;  %v1129_v32 = vor.u32 %v1314_v29, %v1128_v28  ;;  %v1136_v34 = vld [vmem:[%s1806_s15 + $0x30] sm:$0xf]  ;;  %p1583_p8 = pneg %p1582_p4 }
  0x43   : > { %633 = vmatpush.bf16.msra.mxu1 %v1338_v5  ;;  %v1133_v33 = vor.u32 %v1313_v30, %v1130_v31  ;;  %v1316_v35 = vld [vmem:[%s1806_s15 + $0x34] sm:$0xf0]  ;;  %v1315_v36 = vld [vmem:[%s1806_s15 + $0x34] sm:$0xf]  ;;  %v1138_v37 = vld [vmem:[%s1806_s15 + $0x38] sm:$0xf0] }
  0x44   : > { %v1137_v38 = vor.u32 %v1316_v35, %v1136_v34  ;;  %v1141_v39 = vor.u32 %v1315_v36, %v1138_v37  ;;  %v1144_v40 = vld [vmem:[%s1806_s15 + $0x40] sm:$0xf]  ;;  %v1318_v41 = vld [vmem:[%s1806_s15 + $0x44] sm:$0xf0]  ;;  %v1317_v42 = vld [vmem:[%s1806_s15 + $0x44] sm:$0xf]  ;;  %p1588_p10 = pnand %p1587_p2, %p1583_p8 }
  0x45   : > { %v1146_v43 = vld [vmem:[%s1806_s15 + $0x48] sm:$0xf0]  ;;  %v1145_v44 = vor.u32 %v1318_v41, %v1144_v40  ;;  %v1348_v46 = vld [vmem:[#allocation7 + $0x38] sm:$0xff]  ;;  %v1152_v47 = vld [vmem:[%s1806_s15 + $0x50] sm:$0xf] }
  0x46   : > { %585 = vmatpush.bf16.msra.mxu0 %v1329_v6  ;;  %v1149_v45 = vor.u32 %v1317_v42, %v1146_v43  ;;  %771 = vmatpush.bf16.msra.mxu2 %v1348_v46  ;;  %v1320_v48 = vld [vmem:[%s1806_s15 + $0x54] sm:$0xf0]  ;;  %v1319_v49 = vld [vmem:[%s1806_s15 + $0x54] sm:$0xf]  ;;  %v1154_v50 = vld [vmem:[%s1806_s15 + $0x58] sm:$0xf0] }
  0x47   : > { %634 = vmatpush.bf16.msra.mxu1 %v1337_v7  ;;  %v1153_v51 = vor.u32 %v1320_v48, %v1152_v47  ;;  %v1157_v52 = vor.u32 %v1319_v49, %v1154_v50  ;;  %v1347_v53 = vld [vmem:[#allocation7 + $0x30] sm:$0xff]  ;;  %v1346_v54 = vld [vmem:[#allocation7 + $0x28] sm:$0xff]  ;;  %v1345_v55 = vld [vmem:[#allocation7 + $0x20] sm:$0xff] }
  0x48   : > { %v1160_v56 = vld [vmem:[%s1806_s15 + $0x60] sm:$0xf]  ;;  %v1322_v57 = vld [vmem:[%s1806_s15 + $0x64] sm:$0xf0]  ;;  %v1321_v58 = vld [vmem:[%s1806_s15 + $0x64] sm:$0xf] }
  0x49   : > { %v1162_v59 = vld [vmem:[%s1806_s15 + $0x68] sm:$0xf0]  ;;  %v1161_v60 = vor.u32 %v1322_v57, %v1160_v56  ;;  %v1344_v62 = vld [vmem:[#allocation7 + $0x18] sm:$0xff]  ;;  %v1343_v63 = vld [vmem:[#allocation7 + $0x10] sm:$0xff] }
  0x4a   : > { %586 = vmatpush.bf16.msra.mxu0 %v1328_v8  ;;  %772 = vmatpush.bf16.msra.mxu2 %v1347_v53  ;;  %v1165_v61 = vor.u32 %v1321_v58, %v1162_v59  ;;  %v1342_v0 = vld [vmem:[#allocation7 + $0x8] sm:$0xff]  ;;  %v1168_v1 = vld [vmem:[%s1806_s15 + $0x70] sm:$0xf]  ;;  %v1324_v2 = vld [vmem:[%s1806_s15 + $0x74] sm:$0xf0] }
  0x4b   : > { %635 = vmatpush.bf16.msra.mxu1 %v1336_v9  ;;  %v1323_v3 = vld [vmem:[%s1806_s15 + $0x74] sm:$0xf]  ;;  %v1170_v4 = vld [vmem:[%s1806_s15 + $0x78] sm:$0xf0]  ;;  %v1341_v5 = vld [vmem:[#allocation7] sm:$0xff]  ;;  %v1169_v6 = vor.u32 %v1324_v2, %v1168_v1  ;;  %s977_s15 = scalar_lea.sflag [#allocation4], %s1800_s22 }
  0x4c   : > { %v1173_v7 = vor.u32 %v1323_v3, %v1170_v4 }
  0x4e   : > { %587 = vmatpush.bf16.msra.mxu0 %v1327_v10  ;;  %773 = vmatpush.bf16.msra.mxu2 %v1346_v54  ;;  %v1855_v10 = vld [vmem:[%s1935_s2] ss:$0 sm:$0xff] }
  0x4f   : > { %636 = vmatpush.bf16.msra.mxu1 %v1335_v11 }
  0x52   : > { %588 = vmatpush.bf16.msra.mxu0 %v1326_v12  ;;  %774 = vmatpush.bf16.msra.mxu2 %v1345_v55 }
  0x53   : > { %637 = vmatpush.bf16.msra.mxu1 %v1334_v13 }
  0x56   : > { %589 = vmatpush.bf16.msra.mxu0 %v1325_v14  ;;  %775 = vmatpush.bf16.msra.mxu2 %v1344_v62 }
  0x57   : > { %638 = vmatpush.bf16.msra.mxu1 %v1333_v15 }
  0x59   : > { %590 = vmatmul.bf16.vlgmr.msra.gmra.mxu0 %v1113_v20 }
  0x5a   : > { %639 = vmatmul.bf16.vlgmr.msra.gmra.mxu1 %v1117_v21  ;;  %776 = vmatpush.bf16.msra.mxu2 %v1343_v63 }
  0x5e   : > { %777 = vmatpush.bf16.msra.mxu2 %v1342_v0 }
  0x62   : > { %778 = vmatpush.bf16.msra.mxu2 %v1341_v5 }
  0x69   : > { %595 = vmatmul.bf16.gmra.mxu0 %v1121_v26 }
  0x6a   : > { %644 = vmatmul.bf16.gmra.mxu1 %v1125_v27 }
  0x79   : > { %600 = vmatmul.bf16.gmra.mxu0 %v1129_v32 }
  0x7a   : > { %649 = vmatmul.bf16.gmra.mxu1 %v1133_v33 }
  0x89   : > { %605 = vmatmul.bf16.gmra.mxu0 %v1137_v38 }
  0x8a   : > { %654 = vmatmul.bf16.gmra.mxu1 %v1141_v39 }
  0x99   : > { %610 = vmatmul.bf16.gmra.mxu0 %v1145_v44 }
  0x9a   : > { %659 = vmatmul.bf16.gmra.mxu1 %v1149_v45 }
  0xa9   : > { %615 = vmatmul.bf16.gmra.mxu0 %v1153_v51 }
  0xaa   : > { %664 = vmatmul.bf16.gmra.mxu1 %v1157_v52 }
  0xb9   : > { %620 = vmatmul.bf16.gmra.mxu0 %v1161_v60 }
  0xba   : > { %669 = vmatmul.bf16.gmra.mxu1 %v1165_v61 }
  0xc9   : > { %625 = vmatmul.bf16.gmra.mxu0 %v1169_v6 }
  0xca   : > { %674 = vmatmul.bf16.gmra.mxu1 %v1173_v7 }
  0xd6   : > { %v591_v8 = vpop.f32.mrf.mxu0 }
  0xd7   : > { %v640_v9 = vpop.f32.mrf.mxu1  ;;  %v592_v11 = vadd.f32 %v1855_v10, %v591_v8 }
  0xd9   : > { %v641_v14 = vadd.f32 %v640_v9, %v592_v11 }
  0xdb   : > { %v680_v17 = vmax.f32 %v641_v14, 0.0  ;;  %v1356_v14 = vld [vmem:[#allocation8 + $0x38] sm:$0xff] }
  0xdc   : > { %911 = vmatpush.bf16.msra.mxu3 %v1356_v14 }
  0xde   : > { %v593_v12 = vpop.f32.mrf.mxu0 }
  0xdf   : > { %v642_v13 = vpop.f32.mrf.mxu1  ;;  %v594_v15 = vadd.f32 %v1855_v10, %v593_v12 }
  0xe1   : > { %v643_v16 = vadd.f32 %v642_v13, %v594_v15  ;;  %v1355_v15 = vld [vmem:[#allocation8 + $0x30] sm:$0xff] }
  0xe2   : > { %912 = vmatpush.bf16.msra.mxu3 %v1355_v15 }
  0xe3   : > { %v681_v18 = vmax.f32 %v643_v16, 0.0 }
  0xe5   : > { %v696_v19 = vpack.c.bf16 %v681_v18, %v680_v17  ;;  %v1354_v17 = vld [vmem:[#allocation8 + $0x28] sm:$0xff] }
  0xe6   : > { %v596_v20 = vpop.f32.mrf.mxu0  ;;  %913 = vmatpush.bf16.msra.mxu3 %v1354_v17 }
  0xe7   : > { %v645_v21 = vpop.f32.mrf.mxu1  ;;  %779 = vmatmul.bf16.vlgmr.msra.gmra.mxu2 %v696_v19  ;;  %v597_v22 = vadd.f32 %v1855_v10, %v596_v20 }
  0xe9   : > { %v646_v25 = vadd.f32 %v645_v21, %v597_v22 }
  0xeb   : > { %v682_v28 = vmax.f32 %v646_v25, 0.0 }
  0xee   : > { %v598_v23 = vpop.f32.mrf.mxu0 }
  0xef   : > { %v647_v24 = vpop.f32.mrf.mxu1  ;;  %v599_v26 = vadd.f32 %v1855_v10, %v598_v23  ;;  %v1353_v23 = vld [vmem:[#allocation8 + $0x20] sm:$0xff] }
  0xf0   : > { %914 = vmatpush.bf16.msra.mxu3 %v1353_v23 }
  0xf1   : > { %v648_v27 = vadd.f32 %v647_v24, %v599_v26 }
  0xf3   : > { %v683_v29 = vmax.f32 %v648_v27, 0.0 }
  0xf5   : > { %v697_v30 = vpack.c.bf16 %v683_v29, %v682_v28  ;;  %v1352_v29 = vld [vmem:[#allocation8 + $0x18] sm:$0xff] }
  0xf6   : > { %v601_v31 = vpop.f32.mrf.mxu0  ;;  %915 = vmatpush.bf16.msra.mxu3 %v1352_v29 }
  0xf7   : > { %v650_v32 = vpop.f32.mrf.mxu1  ;;  %784 = vmatmul.bf16.gmra.mxu2 %v697_v30  ;;  %v602_v33 = vadd.f32 %v1855_v10, %v601_v31  ;;  %v1351_v31 = vld [vmem:[#allocation8 + $0x10] sm:$0xff] }
  0xf9   : > { %v651_v36 = vadd.f32 %v650_v32, %v602_v33 }
  0xfa   : > { %916 = vmatpush.bf16.msra.mxu3 %v1351_v31 }
  0xfb   : > { %v684_v39 = vmax.f32 %v651_v36, 0.0  ;;  %v1350_v36 = vld [vmem:[#allocation8 + $0x8] sm:$0xff] }
  0xfe   : > { %v603_v34 = vpop.f32.mrf.mxu0  ;;  %917 = vmatpush.bf16.msra.mxu3 %v1350_v36 }
  0xff   : > { %v652_v35 = vpop.f32.mrf.mxu1  ;;  %v604_v37 = vadd.f32 %v1855_v10, %v603_v34 }
 0x101   : > { %v653_v38 = vadd.f32 %v652_v35, %v604_v37 }
 0x103   : > { %v685_v40 = vmax.f32 %v653_v38, 0.0 }
 0x105   : > { %v698_v41 = vpack.c.bf16 %v685_v40, %v684_v39  ;;  %v1349_v40 = vld [vmem:[#allocation8] sm:$0xff] }
 0x106   : > { %v606_v42 = vpop.f32.mrf.mxu0  ;;  %918 = vmatpush.bf16.msra.mxu3 %v1349_v40 }
 0x107   : > { %v655_v43 = vpop.f32.mrf.mxu1  ;;  %789 = vmatmul.bf16.gmra.mxu2 %v698_v41  ;;  %v607_v44 = vadd.f32 %v1855_v10, %v606_v42 }
 0x109   : > { %v656_v47 = vadd.f32 %v655_v43, %v607_v44  ;;  %v1442_v43 = vld [vmem:[%s1937_s4] ss:$0 sm:$0xff] }
 0x10b   : > { %v686_v50 = vmax.f32 %v656_v47, 0.0 }
 0x10e   : > { %v608_v45 = vpop.f32.mrf.mxu0 }
 0x10f   : > { %v657_v46 = vpop.f32.mrf.mxu1  ;;  %v609_v48 = vadd.f32 %v1855_v10, %v608_v45 }
 0x111   : > { %v658_v49 = vadd.f32 %v657_v46, %v609_v48 }
 0x113   : > { %v687_v51 = vmax.f32 %v658_v49, 0.0 }
 0x115   : > { %v699_v52 = vpack.c.bf16 %v687_v51, %v686_v50 }
 0x116   : > { %v611_v53 = vpop.f32.mrf.mxu0 }
 0x117   : > { %v660_v54 = vpop.f32.mrf.mxu1  ;;  %794 = vmatmul.bf16.gmra.mxu2 %v699_v52  ;;  %v612_v55 = vadd.f32 %v1855_v10, %v611_v53 }
 0x119   : > { %v661_v58 = vadd.f32 %v660_v54, %v612_v55 }
 0x11b   : > { %v688_v61 = vmax.f32 %v661_v58, 0.0 }
 0x11e   : > { %v613_v56 = vpop.f32.mrf.mxu0 }
 0x11f   : > { %v662_v57 = vpop.f32.mrf.mxu1  ;;  %v614_v59 = vadd.f32 %v1855_v10, %v613_v56 }
 0x121   : > { %v663_v60 = vadd.f32 %v662_v57, %v614_v59 }
 0x123   : > { %v689_v62 = vmax.f32 %v663_v60, 0.0 }
 0x125   : > { %v700_v63 = vpack.c.bf16 %v689_v62, %v688_v61 }
 0x126   : > { %v616_v0 = vpop.f32.mrf.mxu0 }
 0x127   : > { %v665_v1 = vpop.f32.mrf.mxu1  ;;  %799 = vmatmul.bf16.gmra.mxu2 %v700_v63  ;;  %v617_v2 = vadd.f32 %v1855_v10, %v616_v0 }
 0x129   : > { %v666_v5 = vadd.f32 %v665_v1, %v617_v2 }
 0x12b   : > { %v690_v8 = vmax.f32 %v666_v5, 0.0 }
 0x12e   : > { %v618_v3 = vpop.f32.mrf.mxu0 }
 0x12f   : > { %v667_v4 = vpop.f32.mrf.mxu1  ;;  %v619_v6 = vadd.f32 %v1855_v10, %v618_v3 }
 0x131   : > { %v668_v7 = vadd.f32 %v667_v4, %v619_v6 }
 0x133   : > { %v691_v9 = vmax.f32 %v668_v7, 0.0 }
 0x135   : > { %v701_v11 = vpack.c.bf16 %v691_v9, %v690_v8 }
 0x136   : > { %v621_v12 = vpop.f32.mrf.mxu0 }
 0x137   : > { %v670_v13 = vpop.f32.mrf.mxu1  ;;  %804 = vmatmul.bf16.gmra.mxu2 %v701_v11  ;;  %v622_v16 = vadd.f32 %v1855_v10, %v621_v12 }
 0x139   : > { %v671_v20 = vadd.f32 %v670_v13, %v622_v16 }
 0x13b   : > { %v692_v24 = vmax.f32 %v671_v20, 0.0 }
 0x13e   : > { %v623_v18 = vpop.f32.mrf.mxu0 }
 0x13f   : > { %v672_v19 = vpop.f32.mrf.mxu1  ;;  %v624_v21 = vadd.f32 %v1855_v10, %v623_v18 }
 0x141   : > { %v673_v22 = vadd.f32 %v672_v19, %v624_v21 }
 0x143   : > { %v693_v25 = vmax.f32 %v673_v22, 0.0 }
 0x145   : > { %v702_v26 = vpack.c.bf16 %v693_v25, %v692_v24 }
 0x146   : > { %v626_v27 = vpop.f32.mrf.mxu0 }
 0x147   : > { %v675_v28 = vpop.f32.mrf.mxu1  ;;  %809 = vmatmul.bf16.gmra.mxu2 %v702_v26  ;;  %v627_v30 = vadd.f32 %v1855_v10, %v626_v27 }
 0x149   : > { %v676_v33 = vadd.f32 %v675_v28, %v627_v30 }
 0x14b   : > { %v694_v38 = vmax.f32 %v676_v33, 0.0 }
 0x14e   : > { %v628_v32 = vpop.f32.mrf.mxu0 }
 0x14f   : > { %v629_v34 = vadd.f32 %v1855_v10, %v628_v32  ;;  %v677_v35 = vpop.f32.mrf.mxu1 }
 0x151   : > { %v678_v37 = vadd.f32 %v677_v35, %v629_v34  ;;  %v1443_v35 = vld [vmem:[%s1939_s6] ss:$0 sm:$0xff] }
 0x153   : > { %v695_v39 = vmax.f32 %v678_v37, 0.0 }
 0x155   : > { %v703_v41 = vpack.c.bf16 %v695_v39, %v694_v38 }
 0x157   : > { %814 = vmatmul.bf16.gmra.mxu2 %v703_v41 }
 0x16a   : > { %v780_v42 = vpop.f32.mrf.mxu2 }
 0x16b   : > { %v781_v44 = vadd.f32 %v1442_v43, %v780_v42 }
 0x16d   : > { %v820_v47 = vmax.f32 %v781_v44, 0.0 }
 0x172   : > { %v782_v45 = vpop.f32.mrf.mxu2 }
 0x173   : > { %v783_v46 = vadd.f32 %v1442_v43, %v782_v45 }
 0x175   : > { %v821_v10 = vmax.f32 %v783_v46, 0.0 }
 0x177   : > { %v836_v48 = vpack.c.bf16 %v821_v10, %v820_v47 }
 0x179   : > { %919 = vmatmul.bf16.vlgmr.msra.gmra.mxu3 %v836_v48 }
 0x17a   : > { %v785_v49 = vpop.f32.mrf.mxu2 }
 0x17b   : > { %v786_v50 = vadd.f32 %v1442_v43, %v785_v49 }
 0x17d   : > { %v822_v53 = vmax.f32 %v786_v50, 0.0 }
 0x182   : > { %v787_v51 = vpop.f32.mrf.mxu2 }
 0x183   : > { %v788_v52 = vadd.f32 %v1442_v43, %v787_v51 }
 0x185   : > { %v823_v54 = vmax.f32 %v788_v52, 0.0 }
 0x187   : > { %v837_v55 = vpack.c.bf16 %v823_v54, %v822_v53 }
 0x189   : > { %924 = vmatmul.bf16.gmra.mxu3 %v837_v55 }
 0x18a   : > { %v790_v56 = vpop.f32.mrf.mxu2 }
 0x18b   : > { %v791_v57 = vadd.f32 %v1442_v43, %v790_v56 }
 0x18d   : > { %v824_v60 = vmax.f32 %v791_v57, 0.0 }
 0x192   : > { %v792_v58 = vpop.f32.mrf.mxu2 }
 0x193   : > { %v793_v59 = vadd.f32 %v1442_v43, %v792_v58 }
 0x195   : > { %v825_v61 = vmax.f32 %v793_v59, 0.0 }
 0x197   : > { %v838_v62 = vpack.c.bf16 %v825_v61, %v824_v60 }
 0x199   : > { %929 = vmatmul.bf16.gmra.mxu3 %v838_v62 }
 0x19a   : > { %v795_v63 = vpop.f32.mrf.mxu2 }
 0x19b   : > { %v796_v0 = vadd.f32 %v1442_v43, %v795_v63 }
 0x19d   : > { %v826_v3 = vmax.f32 %v796_v0, 0.0 }
 0x1a2   : > { %v797_v1 = vpop.f32.mrf.mxu2 }
 0x1a3   : > { %v798_v2 = vadd.f32 %v1442_v43, %v797_v1 }
 0x1a5   : > { %v827_v4 = vmax.f32 %v798_v2, 0.0 }
 0x1a7   : > { %v839_v5 = vpack.c.bf16 %v827_v4, %v826_v3 }
 0x1a9   : > { %934 = vmatmul.bf16.gmra.mxu3 %v839_v5 }
 0x1aa   : > { %v800_v6 = vpop.f32.mrf.mxu2 }
 0x1ab   : > { %v801_v7 = vadd.f32 %v1442_v43, %v800_v6 }
 0x1ad   : > { %v828_v11 = vmax.f32 %v801_v7, 0.0 }
 0x1b2   : > { %v802_v8 = vpop.f32.mrf.mxu2 }
 0x1b3   : > { %v803_v9 = vadd.f32 %v1442_v43, %v802_v8 }
 0x1b5   : > { %v829_v12 = vmax.f32 %v803_v9, 0.0 }
 0x1b7   : > { %v840_v13 = vpack.c.bf16 %v829_v12, %v828_v11 }
 0x1b9   : > { %939 = vmatmul.bf16.gmra.mxu3 %v840_v13 }
 0x1ba   : > { %v805_v14 = vpop.f32.mrf.mxu2 }
 0x1bb   : > { %v806_v15 = vadd.f32 %v1442_v43, %v805_v14 }
 0x1bd   : > { %v830_v18 = vmax.f32 %v806_v15, 0.0 }
 0x1c2   : > { %v807_v16 = vpop.f32.mrf.mxu2 }
 0x1c3   : > { %v808_v17 = vadd.f32 %v1442_v43, %v807_v16 }
 0x1c5   : > { %v831_v19 = vmax.f32 %v808_v17, 0.0 }
 0x1c7   : > { %v841_v20 = vpack.c.bf16 %v831_v19, %v830_v18 }
 0x1c9   : > { %944 = vmatmul.bf16.gmra.mxu3 %v841_v20 }
 0x1ca   : > { %v810_v21 = vpop.f32.mrf.mxu2 }
 0x1cb   : > { %v811_v22 = vadd.f32 %v1442_v43, %v810_v21 }
 0x1cd   : > { %v832_v25 = vmax.f32 %v811_v22, 0.0 }
 0x1d2   : > { %v812_v23 = vpop.f32.mrf.mxu2 }
 0x1d3   : > { %v813_v24 = vadd.f32 %v1442_v43, %v812_v23 }
 0x1d5   : > { %v833_v26 = vmax.f32 %v813_v24, 0.0 }
 0x1d7   : > { %v842_v27 = vpack.c.bf16 %v833_v26, %v832_v25 }
 0x1d9   : > { %949 = vmatmul.bf16.gmra.mxu3 %v842_v27 }
 0x1da   : > { %v815_v28 = vpop.f32.mrf.mxu2 }
 0x1db   : > { %v816_v29 = vadd.f32 %v1442_v43, %v815_v28 }
 0x1dd   : > { %v834_v32 = vmax.f32 %v816_v29, 0.0 }
 0x1e2   : > { %v817_v30 = vpop.f32.mrf.mxu2 }
 0x1e3   : > { %v818_v31 = vadd.f32 %v1442_v43, %v817_v30 }
 0x1e5   : > { %v835_v33 = vmax.f32 %v818_v31, 0.0 }
 0x1e7   : > { %v843_v34 = vpack.c.bf16 %v835_v33, %v834_v32 }
 0x1e9   : > { %954 = vmatmul.bf16.gmra.mxu3 %v843_v34 }
 0x1fc   : > { %v920_v36 = vpop.f32.mrf.mxu3 }
 0x1fd   : > { %v921_v37 = vadd.f32 %v1443_v35, %v920_v36 }
 0x1ff   : > { %960 = vst [vmem:[%s1881_s23] sm:$0xff] %v921_v37 }
 0x204   : > { %v922_v38 = vpop.f32.mrf.mxu3 }
 0x205   : > { %v923_v39 = vadd.f32 %v1443_v35, %v922_v38 }
 0x207   : > { %961 = vst [vmem:[%s1881_s23 + $0x8] sm:$0xff] %v923_v39 }
 0x20c   : > { %v925_v40 = vpop.f32.mrf.mxu3 }
 0x20d   : > { %v926_v41 = vadd.f32 %v1443_v35, %v925_v40 }
 0x20f   : > { %962 = vst [vmem:[%s1881_s23 + $0x10] sm:$0xff] %v926_v41 }
 0x214   : > { %v927_v42 = vpop.f32.mrf.mxu3 }
 0x215   : > { %v928_v43 = vadd.f32 %v1443_v35, %v927_v42 }
 0x217   : > { %963 = vst [vmem:[%s1881_s23 + $0x18] sm:$0xff] %v928_v43 }
 0x21c   : > { %v930_v44 = vpop.f32.mrf.mxu3 }
 0x21d   : > { %v931_v45 = vadd.f32 %v1443_v35, %v930_v44 }
 0x21f   : > { %964 = vst [vmem:[%s1881_s23 + $0x20] sm:$0xff] %v931_v45 }
 0x224   : > { %v932_v46 = vpop.f32.mrf.mxu3 }
 0x225   : > { %v933_v47 = vadd.f32 %v1443_v35, %v932_v46 }
 0x227   : > { %965 = vst [vmem:[%s1881_s23 + $0x28] sm:$0xff] %v933_v47 }
 0x22c   : > { %v935_v10 = vpop.f32.mrf.mxu3 }
 0x22d   : > { %v936_v48 = vadd.f32 %v1443_v35, %v935_v10 }
 0x22f   : > { %966 = vst [vmem:[%s1881_s23 + $0x30] sm:$0xff] %v936_v48 }
 0x234   : > { %v937_v49 = vpop.f32.mrf.mxu3 }
 0x235   : > { %v938_v50 = vadd.f32 %v1443_v35, %v937_v49 }
 0x237   : > { %967 = vst [vmem:[%s1881_s23 + $0x38] sm:$0xff] %v938_v50 }
 0x23c   : > { %v940_v51 = vpop.f32.mrf.mxu3 }
 0x23d   : > { %v941_v52 = vadd.f32 %v1443_v35, %v940_v51 }
 0x23f   : > { %968 = vst [vmem:[%s1881_s23 + $0x40] sm:$0xff] %v941_v52 }
 0x244   : > { %v942_v53 = vpop.f32.mrf.mxu3 }
 0x245   : > { %v943_v54 = vadd.f32 %v1443_v35, %v942_v53 }
 0x247   : > { %969 = vst [vmem:[%s1881_s23 + $0x48] sm:$0xff] %v943_v54 }
 0x24c   : > { %v945_v55 = vpop.f32.mrf.mxu3 }
 0x24d   : > { %v946_v56 = vadd.f32 %v1443_v35, %v945_v55 }
 0x24f   : > { %970 = vst [vmem:[%s1881_s23 + $0x50] sm:$0xff] %v946_v56 }
 0x254   : > { %v947_v57 = vpop.f32.mrf.mxu3 }
 0x255   : > { %v948_v58 = vadd.f32 %v1443_v35, %v947_v57 }
 0x257   : > { %971 = vst [vmem:[%s1881_s23 + $0x58] sm:$0xff] %v948_v58 }
 0x25c   : > { %v950_v59 = vpop.f32.mrf.mxu3 }
 0x25d   : > { %v951_v60 = vadd.f32 %v1443_v35, %v950_v59 }
 0x25f   : > { %972 = vst [vmem:[%s1881_s23 + $0x60] sm:$0xff] %v951_v60 }
 0x264   : > { %v952_v61 = vpop.f32.mrf.mxu3 }
 0x265   : > { %v953_v62 = vadd.f32 %v1443_v35, %v952_v61 }
 0x267   : > { %973 = vst [vmem:[%s1881_s23 + $0x68] sm:$0xff] %v953_v62 }
 0x26c   : > { %v955_v63 = vpop.f32.mrf.mxu3 }
 0x26d   : > { %v956_v0 = vadd.f32 %v1443_v35, %v955_v63 }
 0x26f   : > { %974 = vst [vmem:[%s1881_s23 + $0x70] sm:$0xff] %v956_v0 }
 0x274   : > { %v957_v1 = vpop.f32.mrf.mxu3 }
 0x275   : > { %v958_v2 = vadd.f32 %v1443_v35, %v957_v1 }
 0x277   : > { %975 = vst [vmem:[%s1881_s23 + $0x78] sm:$0xff] %v958_v2 }
 0x278   : > { %1591 = shalt.err (!%p1588_p10)
}
 0x279   : > { %s1647_s22 = smov 128   ;;  %s1648_s23 = smov 8  }
 0x27a   : > { %1372 = dma.vmem_to_hbm [thread:$0]  (%p1772_p7), %s990_s16, 2048, %s992_s1, %s977_s15, %s1647_s22, %s1647_s22, %s1648_s23  }
 0x27b PF: > { %s1006_s19 = sand.u32 1, %s1626_s24   ;;  %p1949_p12 = scmp.ge.s32.totalorder %s1638_s27, 2 }
 0x27c   : > { %s1007_s20 = scalar_lea.sflag [#allocation4], %s1006_s19 }
 0x27d   : > { %p1389_p13 = pnand %p1949_p12, %p1724_p6 }
 0x27f   : > { %p1390_p0 = pneg %p1389_p13 }
 0x281   : > { %1621 = dma.done.wait (%p1390_p0), %s1007_s20, 2048  }
 0x282   : > { %1623 = vsyncadd (%p1390_p0), %s1007_s20, 4294965248  ;;  %p22_p3 = scmp.ge.s32.totalorder %s1756_s11, 4   ;;  %s1950_s24 = smov %s1630_s25 }
 0x283   : > { %s1951_s25 = smov %s1634_s26  ;;  %s1952_s26 = smov %s1768_s17 }
 0x284   : > { %s1953_s27 = smov %s1756_s11  ;;  %24 = sbr.rel (!%p22_p3) target bundleno = 9 (0x9), region = 105 }
 0x289   :  { %1013 = vsyncpa [#allocation3], 1 }
 0x28a   :  { %1015 = vsyncpa [#allocation3 + $0x1], 1 }
 0x28b   :  { %1016 = vsyncpa [#allocation6], 1 }
 0x28c   :  { %1017 = vsyncpa [#allocation9], 1 }
 0x28d   :  { %1018 = vsyncpa [#allocation4], 1 }
 0x28e   :  { %1020 = vsyncpa [#allocation4 + $0x1], 1 }

</bundles_post_ra>
